<compile_context>
chip_gen: v5e
topology: v5e:2x2
jax: 0.10.0
libtpu: 0.0.40
codegen_flags: <defaults>
</compile_context>

<pallas_src>
import functools

import jax
import jax.numpy as jnp
from jax.experimental import pallas as pl
from jax.experimental.pallas import tpu as pltpu


def _round_up(x, m):
    return (x + m - 1) // m * m


# ---------------------------------------------------------------------------
# Kernel
# ---------------------------------------------------------------------------
def attention_fc_kernel(x_ref, w1f_ref, b1f_ref, w2f_ref, b2_ref,
                        wdp_ref, bdp_ref, out_ref, *, hid):
    x = x_ref[...]                                           # (TB, F) bf16

    # Matmul 1 (fused): cols [0:hid] = attention[0], col `hid` = fc_normal.
    a1 = jnp.dot(x, w1f_ref[...],
                 preferred_element_type=jnp.float32) + b1f_ref[...]      # (TB, Hp) f32
    p_normal = a1[:, hid:hid + 1]                            # fc_normal out, pre-ReLU

    # Matmul 2 consumes only the first Hk lanes (Hk = round_up(hid, 128)); any
    # non-attention column inside that range maps to a zero row of w2f.
    hk = w2f_ref.shape[0]
    h = jnp.maximum(a1[:, :hk], 0.0).astype(jnp.bfloat16)                # (TB, Hk)
    z = jnp.dot(h, w2f_ref[...],
                preferred_element_type=jnp.float32) + b2_ref[...]        # (TB, F) f32

    # sigmoid(z) = 0.5*tanh(z/2) + 0.5 : one EUP op; mul/add ride VALU slack.
    attn = (0.5 * jnp.tanh(0.5 * z) + 0.5).astype(jnp.bfloat16)
    weighted = x * attn                                      # (TB, F) bf16

    # fc_disease on a 128-lane-padded output; column 0 is reserved (zero).
    pd = jnp.dot(weighted, wdp_ref[...],
                 preferred_element_type=jnp.float32) + bdp_ref[...]      # (TB, Cp)

    # Place p_normal in output column 0 with a select (no lane concat); the
    # store stays a single unmasked, lane-dense vst.
    lane = jax.lax.broadcasted_iota(jnp.int32, pd.shape, dimension=1)
    out = jnp.where(lane == 0, p_normal, pd)
    out_ref[...] = out.astype(out_ref.dtype)


# ---------------------------------------------------------------------------
# Host-side parameter packing (fuse fc_normal, pad to 128 lanes, bf16 weights)
# ---------------------------------------------------------------------------
def pack_params(p):
    F, hid = p["w1"].shape
    C = p["wd"].shape[1] + 1
    Hk = _round_up(hid, 128)          # contraction dim of matmul 2
    Hp = _round_up(hid + 1, 128)      # matmul-1 output width (attn hidden + fc_normal)
    Cp = _round_up(C, 128)

    w1f = jnp.zeros((F, Hp), jnp.float32)
    w1f = w1f.at[:, :hid].set(p["w1"]).at[:, hid:hid + 1].set(p["wn"])
    b1f = jnp.zeros((1, Hp), jnp.float32)
    b1f = b1f.at[:, :hid].set(p["b1"]).at[:, hid:hid + 1].set(p["bn"])

    w2f = jnp.zeros((Hk, F), jnp.float32)
    w2f = w2f.at[:hid, :].set(p["w2"])          # rows >= hid (incl. fc_normal) stay zero

    wdp = jnp.zeros((F, Cp), jnp.float32)
    wdp = wdp.at[:, 1:C].set(p["wd"])           # col 0 reserved for p_normal
    bdp = jnp.zeros((1, Cp), jnp.float32)
    bdp = bdp.at[:, 1:C].set(p["bd"])

    return dict(
        hid=int(hid),
        w1f=w1f.astype(jnp.bfloat16), b1f=b1f,
        w2f=w2f.astype(jnp.bfloat16), b2=p["b2"].astype(jnp.float32),
        wdp=wdp.astype(jnp.bfloat16), bdp=bdp,
    )


# ---------------------------------------------------------------------------
# Wrapper
# ---------------------------------------------------------------------------
def attention_fc(x, packed, num_classes, *, tile_b=512, out_dtype=jnp.float32):
    """x: (B, F). packed: output of pack_params. Returns (B, num_classes)."""
    B, F = x.shape
    hid = packed["hid"]
    Hp = packed["w1f"].shape[1]
    Hk = packed["w2f"].shape[0]
    Cp = packed["wdp"].shape[1]
    out_isize = jnp.dtype(out_dtype).itemsize

    # Batch tile: multiple of 16 (bf16 sublane pack); cap so the grid has >= 2
    # steps whenever possible -> ("parallel",) can shard across v7x's 2 TCs.
    align = 16
    tb = max(align, min(_round_up(tile_b, align), _round_up(-(-B // 2), align)))

    weight_bytes = (F * Hp + Hk * F + F * Cp) * 2 + (Hp + F + Cp) * 4

    def vmem_need(t):
        tiles = 2 * (t * F * 2 + t * Cp * out_isize)        # double-buffered x / out
        inter = t * (Hp * 4 + Hk * 2 + F * 6 + Cp * 8)      # a1, h, z, attn*x, pd, out
        return 2 * weight_bytes + tiles + inter + (4 << 20)  # weights are 2x-buffered too

    # Keep within ~40 MiB so the same config also fits v7x's 64 MiB/TC VMEM.
    while tb > align and vmem_need(tb) > (40 << 20):
        tb = _round_up(tb // 2, align)
    # TODO(synk): for very large F the (double-buffered) resident weights alone can
    # exceed the budget; that case needs an extra grid axis tiling F.

    Bp = _round_up(B, tb)
    x = x.astype(jnp.bfloat16)          # halve the streaming x DMA; MXU eats bf16 anyway
    if Bp != B:
        x = jnp.pad(x, ((0, Bp - B), (0, 0)))

    grid = (Bp // tb,)

    def weight_spec(shape):
        return pl.BlockSpec(shape, lambda i: (0, 0))   # VMEM-resident across grid steps

    # Advisory cost estimate (correct contraction dims; bf16 x / padded out bytes).
    flops = 2 * Bp * (F * Hp + Hk * F + F * Cp) + 6 * Bp * F
    bytes_accessed = Bp * F * 2 + weight_bytes + Bp * Cp * out_isize
    cost = pl.CostEstimate(flops=int(flops), transcendentals=int(Bp * F),
                           bytes_accessed=int(bytes_accessed))

    vmem_limit = int(min(48 << 20, max(16 << 20, vmem_need(tb))))

    kernel = functools.partial(attention_fc_kernel, hid=hid)

    out = pl.pallas_call(
        kernel,
        out_shape=jax.ShapeDtypeStruct((Bp, Cp), out_dtype),
        grid_spec=pltpu.PrefetchScalarGridSpec(
            num_scalar_prefetch=0,
            grid=grid,
            in_specs=[
                pl.BlockSpec((tb, F), lambda i: (i, 0)),   # x: batch-tiled, pipelined
                weight_spec((F, Hp)),                      # w1f (attn[0] + fused fc_normal)
                weight_spec((1, Hp)),                      # b1f
                weight_spec((Hk, F)),                      # w2f (attn[2], no inflated K)
                weight_spec((1, F)),                       # b2
                weight_spec((F, Cp)),                      # wdp (fc_disease, lane-padded)
                weight_spec((1, Cp)),                      # bdp
            ],
            out_specs=pl.BlockSpec((tb, Cp), lambda i: (i, 0)),
        ),
        compiler_params=pltpu.CompilerParams(
            dimension_semantics=("parallel",),             # megacore / 2-TC sharding
            vmem_limit_bytes=vmem_limit,
        ),
        cost_estimate=cost,
    )(x, packed["w1f"], packed["b1f"], packed["w2f"], packed["b2"],
      packed["wdp"], packed["bdp"])

    return out[:B, :num_classes]


# ---------------------------------------------------------------------------
# Init + pure-JAX reference
# ---------------------------------------------------------------------------
def init_params(key, in_features, num_classes):
    """Deterministic synthetic init (shapes match the PyTorch module)."""
    hid = in_features // 2
    ks = jax.random.split(key, 8)

    def lin(kw, kb, fan_in, fan_out):
        # weight stored pre-transposed as (fan_in, fan_out); bias as (1, fan_out)
        bound = 1.0 / jnp.sqrt(fan_in)
        w = jax.random.uniform(kw, (fan_in, fan_out), jnp.float32, -bound, bound)
        b = jax.random.uniform(kb, (1, fan_out), jnp.float32, -bound, bound)
        return w, b

    wn, bn = lin(ks[0], ks[1], in_features, 1)                 # fc_normal
    w1, b1 = lin(ks[2], ks[3], in_features, hid)               # attention[0]
    w2, b2 = lin(ks[4], ks[5], hid, in_features)               # attention[2]
    wd, bd = lin(ks[6], ks[7], in_features, num_classes - 1)   # fc_disease
    return dict(wn=wn, bn=bn, w1=w1, b1=b1, w2=w2, b2=b2, wd=wd, bd=bd)


def attention_fc_ref(x, p):
    """Pure-JAX f32 reference mirroring the PyTorch forward."""
    p_normal = x @ p["wn"] + p["bn"]
    h = jnp.maximum(x @ p["w1"] + p["b1"], 0.0)
    attn = jax.nn.sigmoid(h @ p["w2"] + p["b2"])
    weighted = x * attn
    p_disease = weighted @ p["wd"] + p["bd"]
    return jnp.concatenate([p_normal, p_disease], axis=1)


if __name__ == "__main__":
    B, IN_FEATURES, NUM_CLASSES = 8, 32, 5

    key = jax.random.PRNGKey(0)
    kx, kp = jax.random.split(key)
    x = jax.random.normal(kx, (B, IN_FEATURES), jnp.float32)
    params = init_params(kp, IN_FEATURES, NUM_CLASSES)
    packed = pack_params(params)

    out = attention_fc(x, packed, NUM_CLASSES)
    out = jax.block_until_ready(out)

    ref = attention_fc_ref(x, params)
    assert out.shape == (B, NUM_CLASSES), out.shape
    # bf16 MXU / gating inputs -> compare against f32 reference loosely.
    assert jnp.allclose(out, ref, atol=5e-2, rtol=5e-2), "mismatch vs reference"

    print("KERNEL_OK")
</pallas_src>

<mosaic_0001>
module attributes {stable_mosaic.version = 11 : i64} {
  func.func @attention_fc_kernel(%arg0: i32, %arg1: memref<16x32xbf16, #tpu.memory_space<vmem>>, %arg2: memref<32x128xbf16, #tpu.memory_space<vmem>>, %arg3: memref<1x128xf32, #tpu.memory_space<vmem>>, %arg4: memref<128x32xbf16, #tpu.memory_space<vmem>>, %arg5: memref<1x32xf32, #tpu.memory_space<vmem>>, %arg6: memref<32x128xbf16, #tpu.memory_space<vmem>>, %arg7: memref<1x128xf32, #tpu.memory_space<vmem>>, %arg8: memref<16x128xf32, #tpu.memory_space<vmem>>) attributes {dimension_semantics = [#tpu.dimension_semantics<parallel>], iteration_bounds = array<i64: 1>, scalar_prefetch = 0 : i64, scratch_operands = 0 : i64, tpu.core_type = #tpu.core_type<tc>, window_params = [{transform_indices = @transform_0, window_bounds = array<i64: 16, 32>}, {pipeline_mode = #tpu.pipeline_mode<synchronous>, transform_indices = @transform_1, window_bounds = array<i64: 32, 128>}, {pipeline_mode = #tpu.pipeline_mode<synchronous>, transform_indices = @transform_2, window_bounds = array<i64: 1, 128>}, {pipeline_mode = #tpu.pipeline_mode<synchronous>, transform_indices = @transform_3, window_bounds = array<i64: 128, 32>}, {pipeline_mode = #tpu.pipeline_mode<synchronous>, transform_indices = @transform_4, window_bounds = array<i64: 1, 32>}, {pipeline_mode = #tpu.pipeline_mode<synchronous>, transform_indices = @transform_5, window_bounds = array<i64: 32, 128>}, {pipeline_mode = #tpu.pipeline_mode<synchronous>, transform_indices = @transform_6, window_bounds = array<i64: 1, 128>}, {transform_indices = @transform_7, window_bounds = array<i64: 16, 128>}]} {
    %c0 = arith.constant 0 : index
    %c0_0 = arith.constant 0 : index
    %0 = vector.load %arg1[%c0, %c0_0] : memref<16x32xbf16, #tpu.memory_space<vmem>>, vector<16x32xbf16>
    %c0_1 = arith.constant 0 : index
    %c0_2 = arith.constant 0 : index
    %1 = vector.load %arg2[%c0_1, %c0_2] : memref<32x128xbf16, #tpu.memory_space<vmem>>, vector<32x128xbf16>
    %cst = arith.constant dense<0.000000e+00> : vector<16x128xf32>
    %2 = tpu.matmul %0, %1, %cst {dimension_numbers = #tpu.dot_dimension_numbers<[1], [0], [0], [1], [0, 0, 1, 1], [], []>} : vector<16x32xbf16>, vector<32x128xbf16>, vector<16x128xf32> -> vector<16x128xf32>
    %c0_3 = arith.constant 0 : index
    %c0_4 = arith.constant 0 : index
    %3 = vector.load %arg3[%c0_3, %c0_4] : memref<1x128xf32, #tpu.memory_space<vmem>>, vector<1x128xf32>
    %4 = vector.broadcast %3 : vector<1x128xf32> to vector<16x128xf32>
    %5 = arith.addf %2, %4 : vector<16x128xf32>
    %6 = vector.extract_strided_slice %5 {offsets = [0, 16], sizes = [16, 1], strides = [1, 1]} : vector<16x128xf32> to vector<16x1xf32>
    %cst_5 = arith.constant 0.000000e+00 : f32
    %7 = vector.broadcast %cst_5 : f32 to vector<16x128xf32>
    %8 = arith.maximumf %5, %7 : vector<16x128xf32>
    %9 = arith.truncf %8 : vector<16x128xf32> to vector<16x128xbf16>
    %c0_6 = arith.constant 0 : index
    %c0_7 = arith.constant 0 : index
    %10 = vector.load %arg4[%c0_6, %c0_7] : memref<128x32xbf16, #tpu.memory_space<vmem>>, vector<128x32xbf16>
    %cst_8 = arith.constant dense<0.000000e+00> : vector<16x32xf32>
    %11 = tpu.matmul %9, %10, %cst_8 {dimension_numbers = #tpu.dot_dimension_numbers<[1], [0], [0], [1], [0, 0, 1, 1], [], []>} : vector<16x128xbf16>, vector<128x32xbf16>, vector<16x32xf32> -> vector<16x32xf32>
    %c0_9 = arith.constant 0 : index
    %c0_10 = arith.constant 0 : index
    %12 = vector.load %arg5[%c0_9, %c0_10] : memref<1x32xf32, #tpu.memory_space<vmem>>, vector<1x32xf32>
    %13 = vector.broadcast %12 : vector<1x32xf32> to vector<16x32xf32>
    %14 = arith.addf %11, %13 : vector<16x32xf32>
    %cst_11 = arith.constant 5.000000e-01 : f32
    %15 = vector.broadcast %cst_11 : f32 to vector<16x32xf32>
    %16 = arith.mulf %15, %14 : vector<16x32xf32>
    %17 = math.tanh %16 : vector<16x32xf32>
    %cst_12 = arith.constant 5.000000e-01 : f32
    %18 = vector.broadcast %cst_12 : f32 to vector<16x32xf32>
    %19 = arith.mulf %18, %17 : vector<16x32xf32>
    %cst_13 = arith.constant 5.000000e-01 : f32
    %20 = vector.broadcast %cst_13 : f32 to vector<16x32xf32>
    %21 = arith.addf %19, %20 : vector<16x32xf32>
    %22 = arith.truncf %21 : vector<16x32xf32> to vector<16x32xbf16>
    %23 = arith.mulf %0, %22 : vector<16x32xbf16>
    %c0_14 = arith.constant 0 : index
    %c0_15 = arith.constant 0 : index
    %24 = vector.load %arg6[%c0_14, %c0_15] : memref<32x128xbf16, #tpu.memory_space<vmem>>, vector<32x128xbf16>
    %cst_16 = arith.constant dense<0.000000e+00> : vector<16x128xf32>
    %25 = tpu.matmul %23, %24, %cst_16 {dimension_numbers = #tpu.dot_dimension_numbers<[1], [0], [0], [1], [0, 0, 1, 1], [], []>} : vector<16x32xbf16>, vector<32x128xbf16>, vector<16x128xf32> -> vector<16x128xf32>
    %c0_17 = arith.constant 0 : index
    %c0_18 = arith.constant 0 : index
    %26 = vector.load %arg7[%c0_17, %c0_18] : memref<1x128xf32, #tpu.memory_space<vmem>>, vector<1x128xf32>
    %27 = vector.broadcast %26 : vector<1x128xf32> to vector<16x128xf32>
    %28 = arith.addf %25, %27 : vector<16x128xf32>
    %29 = tpu.iota {dimensions = array<i32: 1>} : vector<16x128xi32>
    %c0_i32 = arith.constant 0 : i32
    %30 = vector.broadcast %c0_i32 : i32 to vector<16x128xi32>
    %31 = arith.cmpi eq, %29, %30 : vector<16x128xi32>
    %32 = vector.shape_cast %6 : vector<16x1xf32> to vector<16x1xf32>
    %33 = vector.broadcast %32 : vector<16x1xf32> to vector<16x128xf32>
    %34 = arith.select %31, %33, %28 : vector<16x128xi1>, vector<16x128xf32>
    %c0_19 = arith.constant 0 : index
    %c0_20 = arith.constant 0 : index
    %35 = vector.load %arg8[%c0_19, %c0_20] : memref<16x128xf32, #tpu.memory_space<vmem>>, vector<16x128xf32>
    tpu.vector_store %arg8[%c0_19, %c0_20], %34 {strides = array<i32>} : memref<16x128xf32, #tpu.memory_space<vmem>>, vector<16x128xf32>,
    return
  }
  func.func @transform_0(%arg0: i32) -> (i32, i32) {
    %c0_i32 = arith.constant 0 : i32
    %c0_i32_0 = arith.constant 0 : i32
    return %arg0, %c0_i32 : i32, i32
  }
  func.func @transform_1(%arg0: i32) -> (i32, i32) {
    %c0_i32 = arith.constant 0 : i32
    %c0_i32_0 = arith.constant 0 : i32
    %c0_i32_1 = arith.constant 0 : i32
    return %c0_i32, %c0_i32_0 : i32, i32
  }
  func.func @transform_2(%arg0: i32) -> (i32, i32) {
    %c0_i32 = arith.constant 0 : i32
    %c0_i32_0 = arith.constant 0 : i32
    %c0_i32_1 = arith.constant 0 : i32
    return %c0_i32, %c0_i32_0 : i32, i32
  }
  func.func @transform_3(%arg0: i32) -> (i32, i32) {
    %c0_i32 = arith.constant 0 : i32
    %c0_i32_0 = arith.constant 0 : i32
    %c0_i32_1 = arith.constant 0 : i32
    return %c0_i32, %c0_i32_0 : i32, i32
  }
  func.func @transform_4(%arg0: i32) -> (i32, i32) {
    %c0_i32 = arith.constant 0 : i32
    %c0_i32_0 = arith.constant 0 : i32
    %c0_i32_1 = arith.constant 0 : i32
    return %c0_i32, %c0_i32_0 : i32, i32
  }
  func.func @transform_5(%arg0: i32) -> (i32, i32) {
    %c0_i32 = arith.constant 0 : i32
    %c0_i32_0 = arith.constant 0 : i32
    %c0_i32_1 = arith.constant 0 : i32
    return %c0_i32, %c0_i32_0 : i32, i32
  }
  func.func @transform_6(%arg0: i32) -> (i32, i32) {
    %c0_i32 = arith.constant 0 : i32
    %c0_i32_0 = arith.constant 0 : i32
    %c0_i32_1 = arith.constant 0 : i32
    return %c0_i32, %c0_i32_0 : i32, i32
  }
  func.func @transform_7(%arg0: i32) -> (i32, i32) {
    %c0_i32 = arith.constant 0 : i32
    %c0_i32_0 = arith.constant 0 : i32
    return %arg0, %c0_i32 : i32, i32
  }
}

</mosaic_0001>

<bundles_post_ra>
// kernel: tpu_custom_call.1
= control target key start
LH: loop header
LB: loop body
LE: loop exit
PB: predicated region body
PF: predicated region fallthrough
CT: control target
= control target key end

     0   :  { %s452_s0 = inlined_call_operand.vmem [shape: bf16[16,32], index: 0, kind: input, shape index: {}]   ;;  %s453_s1 = inlined_call_operand.vmem [shape: bf16[32,128], index: 1, kind: input, shape index: {}]   ;;  %s454_s2 = inlined_call_operand.vmem [shape: f32[1,128], index: 2, kind: input, shape index: {}]   ;;  %s455_s3 = inlined_call_operand.vmem [shape: bf16[128,32], index: 3, kind: input, shape index: {}]   ;;  %s456_s4 = inlined_call_operand.vmem [shape: f32[1,32], index: 4, kind: input, shape index: {}]   ;;  %s457_s5 = inlined_call_operand.vmem [shape: bf16[32,128], index: 5, kind: input, shape index: {}]   ;;  %s458_s6 = inlined_call_operand.vmem [shape: f32[1,128], index: 6, kind: input, shape index: {}]   ;;  %s459_s7 = inlined_call_operand.hbm [shape: f32[16,128], index: 7, kind: output, shape index: {}]  }
   0x1   :  { %v303_v0 = vld [vmem:[%s453_s1 + $0x8] sm:$0xff]  ;;  %v311_v1 = vld [vmem:[%s455_s3 + $0x38] sm:$0xff]  ;;  %v302_v2 = vld [vmem:[%s453_s1] sm:$0xff] }
   0x2   :  { %65 = vmatpush.bf16.msra.mxu0 %v303_v0  ;;  %v310_v3 = vld [vmem:[%s455_s3 + $0x30] sm:$0xff]  ;;  %144 = vmatpush.bf16.msra.mxu1 %v311_v1 }
   0x3   :  { %12 = vsyncpa [#allocation3], 0  ;;  %v301_v4 = vld [vmem:[%s452_s0] sm:$0xff]  ;;  %vm55_vm0 = vcmask 261120   ;;  %v309_v5 = vld [vmem:[%s455_s3 + $0x28] sm:$0xff]  ;;  %v352_v8 = vmov 16   ;;  %v212_v45 = vlaneseq }
   0x4   :  { %v308_v6 = vld [vmem:[%s455_s3 + $0x20] sm:$0xff]  ;;  %v307_v7 = vld [vmem:[%s455_s3 + $0x18] sm:$0xff]  ;;  %318 = vset.pattern.permute.xlu0 %v352_v8  ;;  %v306_v9 = vld [vmem:[%s455_s3 + $0x10] sm:$0xff]  ;;  %s235_s10 = sshll.u32 %s459_s7, 4  ;;  %s355_s11 = smov 8   ;;  %s236_s10 = int_to_ptr.hbm [resolvable:$true] %s235_s10 }
   0x5   :  { %v305_v10 = vld [vmem:[%s455_s3 + $0x8] sm:$0xff]  ;;  %v304_v11 = vld [vmem:[%s455_s3] sm:$0xff]  ;;  %v213_v46 = vand.u32 127, %v212_v45 }
   0x6   :  { %66 = vmatpush.bf16.msra.mxu0 %v302_v2  ;;  %145 = vmatpush.bf16.msra.mxu1 %v310_v3  ;;  %v319_v12 = vld [vmem:[%s454_s2] ss:$0 sm:$0xff]  ;;  %v313_v20 = vld [vmem:[%s457_s5 + $0x8] sm:$0xff] }
   0x7   :  { %204 = vmatpush.bf16.msra.mxu2 %v313_v20  ;;  %v312_v21 = vld [vmem:[%s457_s5] sm:$0xff]  ;;  %vm214_vm1 = vcmp.eq.s32.totalorder %v213_v46, 0 }
   0x8   :  { %v320_v22 = vld [vmem:[%s456_s4] ss:$0 sm:$0xff] }
   0x9   :  { %259 = vmatmul.msk.bf16.vlgmr.msra.gmra.mxu0 %vm55_vm0, %v301_v4  ;;  %v28_v35 = vld [vmem:[%s452_s0] sm:$0xff]   ;;  %s353_s0 = smov [#allocation2]  }
   0xa   :  { %146 = vmatpush.bf16.msra.mxu1 %v309_v5  ;;  %v168_v39 = vunpack.c.l.bf16 %v28_v35  ;;  %v169_v40 = vunpack.c.h.bf16 %v28_v35  ;;  %v321_v47 = vld [vmem:[%s458_s6] ss:$0 sm:$0xff]  ;;  %s233_s30 = sshll.u32 %s353_s0, 4  ;;  %s354_s6 = smov 128   ;;  %s234_s30 = int_to_ptr.vmem [resolvable:$true] %s233_s30 }
   0xb   :  { %205 = vmatpush.bf16.msra.mxu2 %v312_v21 }
   0xe   :  { %147 = vmatpush.bf16.msra.mxu1 %v308_v6 }
  0x12   :  { %148 = vmatpush.bf16.msra.mxu1 %v307_v7 }
  0x16   :  { %149 = vmatpush.bf16.msra.mxu1 %v306_v9 }
  0x1a   :  { %150 = vmatpush.bf16.msra.mxu1 %v305_v10 }
  0x1e   :  { %151 = vmatpush.bf16.msra.mxu1 %v304_v11 }
  0x86   :  { %v68_v13 = vpop.f32.mrf.mxu0 }
  0x87   :  { %v69_v14 = vadd.f32 %v319_v12, %v68_v13 }
  0x89   :  { %217 = vperm.xlu0 %318, %v69_v14   ;;  %v73_v17 = vmax.f32 %v69_v14, 0.0 }
  0x8e   :  { %v70_v15 = vpop.f32.mrf.mxu0 }
  0x8f   :  { %v71_v16 = vadd.f32 %v319_v12, %v70_v15 }
  0x91   :  { %v74_v18 = vmax.f32 %v71_v16, 0.0  ;;  %222 = vperm.xlu0 %318, %v71_v16  }
  0x93   :  { %v75_v19 = vpack.c.bf16 %v74_v18, %v73_v17 }
  0x95   :  { %152 = vmatmul.bf16.vlgmr.msra.gmra.mxu1 %v75_v19 }
  0xfb   :  { %v218_v48 = vpop.permute.xlu0 %217 }
 0x103   :  { %v223_v54 = vpop.permute.xlu0 %222 }
 0x112   :  { %v153_v23 = vpop.f32.mrf.mxu1 }
 0x113   :  { %v154_v24 = vadd.f32 %v320_v22, %v153_v23 }
 0x115   :  { %v158_v25 = vmul.f32 0.5, %v154_v24 }
 0x117   :  { %322 = vtanh.f32 %v158_v25 }
 0x11a   :  { %v155_v26 = vpop.f32.mrf.mxu1 }
 0x11b   :  { %v156_v27 = vadd.f32 %v320_v22, %v155_v26 }
 0x11d   :  { %v323_v28 = vpop.eup %322  ;;  %v159_v29 = vmul.f32 0.5, %v156_v27 }
 0x11e   :  { %v162_v30 = vmul.f32 0.5, %v323_v28 }
 0x11f   :  { %324 = vtanh.f32 %v159_v29 }
 0x120   :  { %v164_v31 = vadd.f32 0.5, %v162_v30 }
 0x122   :  { %v166_v33 = vpack.c.bf16 %v164_v31, %v164_v31 }
 0x124   :  { %v170_v37 = vunpack.c.l.bf16 %v166_v33 }
 0x125   :  { %v325_v32 = vpop.eup %324 }
 0x126   :  { %v163_v34 = vmul.f32 0.5, %v325_v32  ;;  %v172_v42 = vmul.f32 %v170_v37, %v168_v39 }
 0x128   :  { %v165_v36 = vadd.f32 0.5, %v163_v34 }
 0x12a   :  { %v167_v38 = vpack.c.bf16 %v165_v36, %v165_v36 }
 0x12c   :  { %v171_v41 = vunpack.c.l.bf16 %v167_v38 }
 0x12e   :  { %v173_v43 = vmul.f32 %v171_v41, %v169_v40 }
 0x130   :  { %v174_v44 = vpack.c.bf16 %v173_v43, %v172_v42 }
 0x132   :  { %300 = vmatmul.msk.bf16.vlgmr.msra.gmra.mxu2 %vm55_vm0, %v174_v44 }
 0x1b5   :  { %v207_v49 = vpop.f32.mrf.mxu2 }
 0x1b6   :  { %v208_v50 = vadd.f32 %v321_v47, %v207_v49 }
 0x1b8   :  { %v225_v51 = vsel %vm214_vm1, %v218_v48, %v208_v50 }
 0x1b9   :  { %227 = vst [vmem:[#allocation2] sm:$0xff] %v225_v51 }
 0x1bd   :  { %v209_v52 = vpop.f32.mrf.mxu2 }
 0x1be   :  { %v210_v53 = vadd.f32 %v321_v47, %v209_v52 }
 0x1c0   :  { %v226_v55 = vsel %vm214_vm1, %v223_v54, %v210_v53 }
 0x1c1   :  { %228 = vst [vmem:[#allocation2 + $0x8] sm:$0xff] %v226_v55 }
 0x1c2   :  { %241 = dma.vmem_to_hbm [thread:$0]  %s234_s30, 256, %s236_s10, [#allocation3], %s354_s6, %s354_s6, %s355_s11  }
 0x1c3   :  { %350 = dma.done.wait [#allocation3], 256  }
 0x1c4   :  { %351 = vsyncadd [#allocation3], 4294967040 }
 0x1c5   :  { %246 = vsyncpa [#allocation3], 1 }

</bundles_post_ra>
